<compile_context>
chip_gen: v7x
topology: tpu7x:2x2x1
jax: 0.10.0
libtpu: 0.0.40
codegen_flags: <defaults>
</compile_context>

<pallas_src>
import functools

import jax
import jax.numpy as jnp
from jax import lax
from jax.experimental import pallas as pl
from jax.experimental.pallas import tpu as pltpu


def _round_up(x, m):
    return ((x + m - 1) // m) * m


def _mlp_kernel(x_ref, w_ref, b_ref, o_ref, *, in_dim, n_layers, positive):
    """One batch tile of the MLP, features on sublanes / batch on lanes.

    x_ref: (in_dim, tile_n)      f32 state points, transposed
    w_ref: (n_layers, H, H)      f32 W^T per layer, zero padded to H (=32)
    b_ref: (n_layers, H, 1)      f32 biases, zero padded
    o_ref: (1, tile_n)           f32 output row (lane dense)
    """
    x = x_ref[...]

    # Layer 0: contraction dim == in_dim (tiny, e.g. 2) -> VPU broadcast
    # mul/adds instead of a degenerate MXU matmul.  w_ref[0][:, k] is the
    # weight vector from state variable k to all hidden units.
    w0 = w_ref[0]                                   # (H, H), cols >= in_dim are 0
    h = b_ref[0] + w0[:, 0:1] * x[0:1, :]           # (H, 1)*(1, tile_n) -> (H, tile_n)
    for k in range(1, in_dim):
        h = h + w0[:, k:k + 1] * x[k:k + 1, :]
    h = jnp.tanh(h)

    # Hidden tanh layers: (H, H) @ (H, tile_n) on the MXU, lane-dense activations.
    for l in range(1, n_layers - 1):
        h = jnp.tanh(
            jnp.dot(w_ref[l], h,
                    preferred_element_type=jnp.float32,
                    precision=lax.Precision.HIGHEST)
            + b_ref[l])

    # Output layer (fan_out = 1): only row 0 of the padded result is meaningful.
    y = (jnp.dot(w_ref[n_layers - 1], h,
                 preferred_element_type=jnp.float32,
                 precision=lax.Precision.HIGHEST)
         + b_ref[n_layers - 1])[0:1, :]             # (1, tile_n), lane dense

    if positive:  # config['positive'] (default False) -> softplus on the output
        y = jnp.maximum(y, 0.0) + jnp.log1p(jnp.exp(-jnp.abs(y)))

    o_ref[...] = y.astype(o_ref.dtype)


def pack_params(params, hpad=None):
    """Pack per-layer (W, b) (torch layout: W (in,out), b (1,out)) into
    zero-padded stacks: w_stack (L, H, H) holding W^T, b_stack (L, H, 1)."""
    widths = [d for (w, _) in params for d in w.shape]
    if hpad is None:
        hpad = max(8, _round_up(max(widths), 8))
    n_layers = len(params)
    w_stack = jnp.zeros((n_layers, hpad, hpad), jnp.float32)
    b_stack = jnp.zeros((n_layers, hpad, 1), jnp.float32)
    for l, (w, b) in enumerate(params):
        fan_in, fan_out = w.shape
        assert fan_in <= hpad and fan_out <= hpad
        w_stack = w_stack.at[l, :fan_out, :fan_in].set(w.T.astype(jnp.float32))
        b_stack = b_stack.at[l, :fan_out, 0].set(b.reshape(-1).astype(jnp.float32))
    return w_stack, b_stack


def learnable_var_forward(x, w_stack, b_stack, *, tile_n=1024, positive=False):
    """Pallas forward of LearnableVar's MLP (positive=False default config).

    x: (N, input_size) or (input_size,) state-variable points.
    w_stack, b_stack: packed parameters from pack_params().
    Returns (N, 1) float32, matching the torch module's forward."""
    if x.ndim == 1:
        x = x[None, :]                      # mirrors X.unsqueeze(0)
    n, in_dim = x.shape
    n_layers, hpad, _ = w_stack.shape

    # Lane-dense tile: multiple of 128, no larger than the padded batch.
    tile_n = max(128, _round_up(min(tile_n, _round_up(n, 128)), 128))
    n_pad = _round_up(n, tile_n)

    # Batch-on-lanes layout: (in_dim, n_pad); padded batch columns are zero.
    x_t = jnp.zeros((in_dim, n_pad), jnp.float32).at[:, :n].set(
        x.T.astype(jnp.float32))

    kernel = functools.partial(_mlp_kernel, in_dim=in_dim,
                               n_layers=n_layers, positive=positive)

    flops = 2 * n_pad * (in_dim * hpad + (n_layers - 2) * hpad * hpad + hpad)
    transcendentals = (n_layers - 1) * n_pad * hpad
    bytes_accessed = int(x_t.size + n_pad + w_stack.size + b_stack.size) * 4

    out = pl.pallas_call(
        kernel,
        out_shape=jax.ShapeDtypeStruct((1, n_pad), jnp.float32),
        grid_spec=pltpu.PrefetchScalarGridSpec(
            num_scalar_prefetch=0,
            grid=(n_pad // tile_n,),
            in_specs=[
                pl.BlockSpec((in_dim, tile_n), lambda i: (0, i)),
                pl.BlockSpec(tuple(w_stack.shape), lambda i: (0, 0, 0)),
                pl.BlockSpec(tuple(b_stack.shape), lambda i: (0, 0, 0)),
            ],
            out_specs=pl.BlockSpec((1, tile_n), lambda i: (0, i)),
        ),
        compiler_params=pltpu.CompilerParams(
            dimension_semantics=("parallel",)),
        cost_estimate=pl.CostEstimate(flops=int(flops),
                                      transcendentals=int(transcendentals),
                                      bytes_accessed=bytes_accessed),
    )(x_t, w_stack, b_stack)

    return out[0, :n, None]                 # (N, 1)


def init_params(key, layer_sizes):
    """Deterministic init mimicking torch.nn.Linear (uniform +/- 1/sqrt(fan_in)).
    Weights stored as (in, out); biases as (1, out)."""
    params = []
    for fan_in, fan_out in zip(layer_sizes[:-1], layer_sizes[1:]):
        key, kw, kb = jax.random.split(key, 3)
        bound = 1.0 / jnp.sqrt(jnp.float32(fan_in))
        w = jax.random.uniform(kw, (fan_in, fan_out), jnp.float32, -bound, bound)
        b = jax.random.uniform(kb, (1, fan_out), jnp.float32, -bound, bound)
        params.append((w, b))
    return params


def reference_forward(x, params):
    """Plain-JAX reference (full-precision f32 dots)."""
    if x.ndim == 1:
        x = x[None, :]
    h = x.astype(jnp.float32)
    for (w, b) in params[:-1]:
        h = jnp.tanh(jnp.dot(h, w, precision=lax.Precision.HIGHEST) + b)
    w, b = params[-1]
    return jnp.dot(h, w, precision=lax.Precision.HIGHEST) + b


if __name__ == "__main__":
    # LearnableVar("q", state_variables=["e", "t"], config={}) defaults:
    #   input_size=2, hidden_units=[30, 30, 30, 30], output_size=1, Tanh, positive=False
    state_variables = ["e", "t"]
    input_size = len(state_variables)
    hidden_units = [30, 30, 30, 30]
    layer_sizes = [input_size] + hidden_units + [1]

    key = jax.random.PRNGKey(0)
    key, kp, kx, kx2 = jax.random.split(key, 4)
    params = init_params(kp, layer_sizes)
    w_stack, b_stack = pack_params(params)

    # Tolerance: kernel evaluates the transposed form W^T @ x^T with padded
    # K=32, so f32 accumulation order differs slightly from the reference.
    ATOL = RTOL = 2e-5

    # Small batch of state points (module-scale usage).
    batch = 8
    x = jax.random.uniform(kx, (batch, input_size), jnp.float32)
    y = jax.block_until_ready(learnable_var_forward(x, w_stack, b_stack))
    y_ref = reference_forward(x, params)
    assert y.shape == (batch, 1)
    assert jnp.allclose(y, y_ref, atol=ATOL, rtol=RTOL), (y, y_ref)

    # 1-D input (mirrors X.unsqueeze(0) in the torch forward).
    y1 = jax.block_until_ready(learnable_var_forward(x[0], w_stack, b_stack))
    assert y1.shape == (1, 1)
    assert jnp.allclose(y1, y_ref[0:1], atol=ATOL, rtol=RTOL)

    # Larger, non-multiple-of-tile batch: exercises wrapper-side padding and a
    # multi-step "parallel" grid (megacore-shardable on v7x).
    batch2 = 300
    x2 = jax.random.uniform(kx2, (batch2, input_size), jnp.float32)
    y2 = jax.block_until_ready(
        learnable_var_forward(x2, w_stack, b_stack, tile_n=128))
    y2_ref = reference_forward(x2, params)
    assert y2.shape == (batch2, 1)
    assert jnp.allclose(y2, y2_ref, atol=ATOL, rtol=RTOL), (
        float(jnp.max(jnp.abs(y2 - y2_ref))))

    # TODO(synk): compute_derivative / get_all_derivatives (the autograd-based
    # derivative dictionary) have no direct Pallas equivalent; in JAX they would
    # be jax.grad / jax.jacfwd wrapped around this forward in plain JAX.
    print("KERNEL_OK")
</pallas_src>

<mosaic_0001>
module attributes {stable_mosaic.version = 11 : i64} {
  func.func @_mlp_kernel(%arg0: i32, %arg1: memref<2x128xf32, #tpu.memory_space<vmem>>, %arg2: memref<5x32x32xf32, #tpu.memory_space<vmem>>, %arg3: memref<5x32x1xf32, #tpu.memory_space<vmem>>, %arg4: memref<1x128xf32, #tpu.memory_space<vmem>>) attributes {dimension_semantics = [#tpu.dimension_semantics<parallel>], iteration_bounds = array<i64: 1>, scalar_prefetch = 0 : i64, scratch_operands = 0 : i64, tpu.core_type = #tpu.core_type<tc>, window_params = [{transform_indices = @transform_0, window_bounds = array<i64: 2, 128>}, {pipeline_mode = #tpu.pipeline_mode<synchronous>, transform_indices = @transform_1, window_bounds = array<i64: 5, 32, 32>}, {pipeline_mode = #tpu.pipeline_mode<synchronous>, transform_indices = @transform_2, window_bounds = array<i64: 5, 32, 1>}, {transform_indices = @transform_3, window_bounds = array<i64: 1, 128>}]} {
    %c0 = arith.constant 0 : index
    %c0_0 = arith.constant 0 : index
    %0 = vector.load %arg1[%c0, %c0_0] : memref<2x128xf32, #tpu.memory_space<vmem>>, vector<2x128xf32>
    %c0_1 = arith.constant 0 : index
    %c0_2 = arith.constant 0 : index
    %c0_3 = arith.constant 0 : index
    %1 = vector.load %arg2[%c0_1, %c0_2, %c0_3] : memref<5x32x32xf32, #tpu.memory_space<vmem>>, vector<1x32x32xf32>
    %2 = vector.shape_cast %1 : vector<1x32x32xf32> to vector<32x32xf32>
    %c0_4 = arith.constant 0 : index
    %c0_5 = arith.constant 0 : index
    %c0_6 = arith.constant 0 : index
    %3 = vector.load %arg3[%c0_4, %c0_5, %c0_6] : memref<5x32x1xf32, #tpu.memory_space<vmem>>, vector<1x32x1xf32>
    %4 = vector.shape_cast %3 : vector<1x32x1xf32> to vector<32x1xf32>
    %5 = vector.extract_strided_slice %2 {offsets = [0, 0], sizes = [32, 1], strides = [1, 1]} : vector<32x32xf32> to vector<32x1xf32>
    %6 = vector.extract_strided_slice %0 {offsets = [0, 0], sizes = [1, 128], strides = [1, 1]} : vector<2x128xf32> to vector<1x128xf32>
    %7 = vector.broadcast %5 : vector<32x1xf32> to vector<32x128xf32>
    %8 = vector.broadcast %6 : vector<1x128xf32> to vector<32x128xf32>
    %9 = arith.mulf %7, %8 : vector<32x128xf32>
    %10 = vector.broadcast %4 : vector<32x1xf32> to vector<32x128xf32>
    %11 = arith.addf %10, %9 : vector<32x128xf32>
    %12 = vector.extract_strided_slice %2 {offsets = [0, 1], sizes = [32, 1], strides = [1, 1]} : vector<32x32xf32> to vector<32x1xf32>
    %13 = vector.extract_strided_slice %0 {offsets = [1, 0], sizes = [1, 128], strides = [1, 1]} : vector<2x128xf32> to vector<1x128xf32>
    %14 = vector.broadcast %12 : vector<32x1xf32> to vector<32x128xf32>
    %15 = vector.broadcast %13 : vector<1x128xf32> to vector<32x128xf32>
    %16 = arith.mulf %14, %15 : vector<32x128xf32>
    %17 = arith.addf %11, %16 : vector<32x128xf32>
    %18 = math.tanh %17 : vector<32x128xf32>
    %c1 = arith.constant 1 : index
    %c0_7 = arith.constant 0 : index
    %c0_8 = arith.constant 0 : index
    %19 = vector.load %arg2[%c1, %c0_7, %c0_8] : memref<5x32x32xf32, #tpu.memory_space<vmem>>, vector<1x32x32xf32>
    %20 = vector.shape_cast %19 : vector<1x32x32xf32> to vector<32x32xf32>
    %cst = arith.constant dense<0.000000e+00> : vector<32x128xf32>
    %21 = tpu.matmul %20, %18, %cst {dimension_numbers = #tpu.dot_dimension_numbers<[1], [0], [0], [1], [0, 0, 1, 1], [], []>, precision = #tpu.contract_precision<fp32>} : vector<32x32xf32>, vector<32x128xf32>, vector<32x128xf32> -> vector<32x128xf32>
    %c1_9 = arith.constant 1 : index
    %c0_10 = arith.constant 0 : index
    %c0_11 = arith.constant 0 : index
    %22 = vector.load %arg3[%c1_9, %c0_10, %c0_11] : memref<5x32x1xf32, #tpu.memory_space<vmem>>, vector<1x32x1xf32>
    %23 = vector.shape_cast %22 : vector<1x32x1xf32> to vector<32x1xf32>
    %24 = vector.broadcast %23 : vector<32x1xf32> to vector<32x128xf32>
    %25 = arith.addf %21, %24 : vector<32x128xf32>
    %26 = math.tanh %25 : vector<32x128xf32>
    %c2 = arith.constant 2 : index
    %c0_12 = arith.constant 0 : index
    %c0_13 = arith.constant 0 : index
    %27 = vector.load %arg2[%c2, %c0_12, %c0_13] : memref<5x32x32xf32, #tpu.memory_space<vmem>>, vector<1x32x32xf32>
    %28 = vector.shape_cast %27 : vector<1x32x32xf32> to vector<32x32xf32>
    %cst_14 = arith.constant dense<0.000000e+00> : vector<32x128xf32>
    %29 = tpu.matmul %28, %26, %cst_14 {dimension_numbers = #tpu.dot_dimension_numbers<[1], [0], [0], [1], [0, 0, 1, 1], [], []>, precision = #tpu.contract_precision<fp32>} : vector<32x32xf32>, vector<32x128xf32>, vector<32x128xf32> -> vector<32x128xf32>
    %c2_15 = arith.constant 2 : index
    %c0_16 = arith.constant 0 : index
    %c0_17 = arith.constant 0 : index
    %30 = vector.load %arg3[%c2_15, %c0_16, %c0_17] : memref<5x32x1xf32, #tpu.memory_space<vmem>>, vector<1x32x1xf32>
    %31 = vector.shape_cast %30 : vector<1x32x1xf32> to vector<32x1xf32>
    %32 = vector.broadcast %31 : vector<32x1xf32> to vector<32x128xf32>
    %33 = arith.addf %29, %32 : vector<32x128xf32>
    %34 = math.tanh %33 : vector<32x128xf32>
    %c3 = arith.constant 3 : index
    %c0_18 = arith.constant 0 : index
    %c0_19 = arith.constant 0 : index
    %35 = vector.load %arg2[%c3, %c0_18, %c0_19] : memref<5x32x32xf32, #tpu.memory_space<vmem>>, vector<1x32x32xf32>
    %36 = vector.shape_cast %35 : vector<1x32x32xf32> to vector<32x32xf32>
    %cst_20 = arith.constant dense<0.000000e+00> : vector<32x128xf32>
    %37 = tpu.matmul %36, %34, %cst_20 {dimension_numbers = #tpu.dot_dimension_numbers<[1], [0], [0], [1], [0, 0, 1, 1], [], []>, precision = #tpu.contract_precision<fp32>} : vector<32x32xf32>, vector<32x128xf32>, vector<32x128xf32> -> vector<32x128xf32>
    %c3_21 = arith.constant 3 : index
    %c0_22 = arith.constant 0 : index
    %c0_23 = arith.constant 0 : index
    %38 = vector.load %arg3[%c3_21, %c0_22, %c0_23] : memref<5x32x1xf32, #tpu.memory_space<vmem>>, vector<1x32x1xf32>
    %39 = vector.shape_cast %38 : vector<1x32x1xf32> to vector<32x1xf32>
    %40 = vector.broadcast %39 : vector<32x1xf32> to vector<32x128xf32>
    %41 = arith.addf %37, %40 : vector<32x128xf32>
    %42 = math.tanh %41 : vector<32x128xf32>
    %c4 = arith.constant 4 : index
    %c0_24 = arith.constant 0 : index
    %c0_25 = arith.constant 0 : index
    %43 = vector.load %arg2[%c4, %c0_24, %c0_25] : memref<5x32x32xf32, #tpu.memory_space<vmem>>, vector<1x32x32xf32>
    %44 = vector.shape_cast %43 : vector<1x32x32xf32> to vector<32x32xf32>
    %cst_26 = arith.constant dense<0.000000e+00> : vector<32x128xf32>
    %45 = tpu.matmul %44, %42, %cst_26 {dimension_numbers = #tpu.dot_dimension_numbers<[1], [0], [0], [1], [0, 0, 1, 1], [], []>, precision = #tpu.contract_precision<fp32>} : vector<32x32xf32>, vector<32x128xf32>, vector<32x128xf32> -> vector<32x128xf32>
    %c4_27 = arith.constant 4 : index
    %c0_28 = arith.constant 0 : index
    %c0_29 = arith.constant 0 : index
    %46 = vector.load %arg3[%c4_27, %c0_28, %c0_29] : memref<5x32x1xf32, #tpu.memory_space<vmem>>, vector<1x32x1xf32>
    %47 = vector.shape_cast %46 : vector<1x32x1xf32> to vector<32x1xf32>
    %48 = vector.broadcast %47 : vector<32x1xf32> to vector<32x128xf32>
    %49 = arith.addf %45, %48 : vector<32x128xf32>
    %50 = vector.extract_strided_slice %49 {offsets = [0, 0], sizes = [1, 128], strides = [1, 1]} : vector<32x128xf32> to vector<1x128xf32>
    %c0_30 = arith.constant 0 : index
    %c0_31 = arith.constant 0 : index
    %51 = vector.load %arg4[%c0_30, %c0_31] : memref<1x128xf32, #tpu.memory_space<vmem>>, vector<1x128xf32>
    tpu.vector_store %arg4[%c0_30, %c0_31], %50 {strides = array<i32>} : memref<1x128xf32, #tpu.memory_space<vmem>>, vector<1x128xf32>,
    return
  }
  func.func @transform_0(%arg0: i32) -> (i32, i32) {
    %c0_i32 = arith.constant 0 : i32
    %c0_i32_0 = arith.constant 0 : i32
    return %c0_i32, %arg0 : i32, i32
  }
  func.func @transform_1(%arg0: i32) -> (i32, i32, i32) {
    %c0_i32 = arith.constant 0 : i32
    %c0_i32_0 = arith.constant 0 : i32
    %c0_i32_1 = arith.constant 0 : i32
    %c0_i32_2 = arith.constant 0 : i32
    return %c0_i32, %c0_i32_0, %c0_i32_1 : i32, i32, i32
  }
  func.func @transform_2(%arg0: i32) -> (i32, i32, i32) {
    %c0_i32 = arith.constant 0 : i32
    %c0_i32_0 = arith.constant 0 : i32
    %c0_i32_1 = arith.constant 0 : i32
    %c0_i32_2 = arith.constant 0 : i32
    return %c0_i32, %c0_i32_0, %c0_i32_1 : i32, i32, i32
  }
  func.func @transform_3(%arg0: i32) -> (i32, i32) {
    %c0_i32 = arith.constant 0 : i32
    %c0_i32_0 = arith.constant 0 : i32
    return %c0_i32, %arg0 : i32, i32
  }
}

</mosaic_0001>

<bundles_post_ra>
// kernel: tpu_custom_call.1
= control target key start
LH: loop header
LB: loop body
LE: loop exit
PB: predicated region body
PF: predicated region fallthrough
CT: control target
= control target key end

     0   :  { %v3641_v2 = vmov 0   ;;  %s4049_s0 = inlined_call_operand.vmem [shape: f32[2,128], index: 0, kind: input, shape index: {}]   ;;  %s4050_s1 = inlined_call_operand.vmem [shape: f32[5,32,32], index: 1, kind: input, shape index: {}]   ;;  %s4051_s2 = inlined_call_operand.vmem [shape: f32[5,32,1], index: 2, kind: input, shape index: {}]   ;;  %s4052_s3 = inlined_call_operand.hbm [shape: f32[1,128], index: 3, kind: output, shape index: {}]  }
   0x1   :  { %v20_v0 = vld [vmem:[%s4051_s2] sm:$0xff]  ;;  %3578 = vset.pattern.permute.xlu1 %v3641_v2  ;;  %3577 = vset.pattern.permute.xlu0 %v3641_v2  ;;  %v21_v3 = vld [vmem:[%s4051_s2 + $0x8] sm:$0xff] }
   0x2   :  { %v16_v1 = vld [vmem:[%s4050_s1] sm:$0xff]  ;;  %54 = vperm.xlu1 %3578, %v20_v0   ;;  %v17_v4 = vld [vmem:[%s4050_s1 + $0x8] sm:$0xff] }
   0x3   :  { %26 = vperm.xlu0 %3577, %v16_v1  }
   0x4   :  { %8 = vsyncpa [#allocation3], 0  ;;  %v19_v5 = vld [vmem:[%s4050_s1 + $0x18] sm:$0xff]  ;;  %v3642_v6 = vmov 1   ;;  %v18_v7 = vld [vmem:[%s4050_s1 + $0x10] sm:$0xff]  ;;  %vm138_vm0 = vcmask 261120   ;;  %v44_v30 = vlaneseq }
   0x5   :  { %v22_v8 = vld [vmem:[%s4051_s2 + $0x10] sm:$0xff]  ;;  %v23_v9 = vld [vmem:[%s4051_s2 + $0x18] sm:$0xff]  ;;  %v2739_v10 = vld [vmem:[%s4050_s1 + $0x20] sm:$0xff] }
   0x6   :  { %59 = vperm.xlu1 %3578, %v21_v3   ;;  %v140_v11 = vsel %vm138_vm0, %v2739_v10, 0  ;;  %v2743_v17 = vld [vmem:[%s4051_s2 + $0x20] sm:$0xff]  ;;  %v2744_v18 = vld [vmem:[%s4051_s2 + $0x28] sm:$0xff]  ;;  %v2745_v19 = vld [vmem:[%s4051_s2 + $0x30] sm:$0xff]  ;;  %v45_v31 = vshrl.u32 %v44_v30, 7 }
   0x7   :  { %31 = vperm.xlu0 %3577, %v17_v4   ;;  %v3692_v12 = vand.u32 4294901760, %v140_v11  ;;  %v2751_v20 = vld [vmem:[%s4051_s2 + $0x40] sm:$0xff]  ;;  %v2746_v21 = vld [vmem:[%s4051_s2 + $0x38] sm:$0xff]  ;;  %v2753_v22 = vld [vmem:[%s4051_s2 + $0x50] sm:$0xff] }
   0x8   :  { %v2752_v23 = vld [vmem:[%s4051_s2 + $0x48] sm:$0xff]  ;;  %v2759_v24 = vld [vmem:[%s4051_s2 + $0x60] sm:$0xff]  ;;  %v2754_v25 = vld [vmem:[%s4051_s2 + $0x58] sm:$0xff]  ;;  %v46_v33 = vsub.s32 0, %v45_v31  ;;  %v94_v36 = vsub.s32 1, %v45_v31 }
   0x9   :  { %v3695_v13 = vsub.f32 %v140_v11, %v3692_v12  ;;  %v2761_v26 = vld [vmem:[%s4051_s2 + $0x70] sm:$0xff]  ;;  %v2760_v27 = vld [vmem:[%s4051_s2 + $0x68] sm:$0xff]  ;;  %v2767_v28 = vld [vmem:[%s4051_s2 + $0x80] sm:$0xff] }
   0xa   :  { %3579 = vset.pattern.permute.xlu1 %v3642_v6  ;;  %v2762_v29 = vld [vmem:[%s4051_s2 + $0x78] sm:$0xff]  ;;  %v15_v35 = vld [vmem:[%s4049_s0] sm:$0x3]  ;;  %v2740_v60 = vld [vmem:[%s4050_s1 + $0x28] sm:$0xff] }
   0xb   :  { %41 = vperm.xlu0 %3577, %v19_v5   ;;  %81 = vperm.xlu1 %3579, %v17_v4   ;;  %v222_v14 = vand.u32 4294901760, %v3695_v13  ;;  %v47_v37 = vrot.slane %v15_v35, %v46_v33  ;;  %v95_v41 = vrot.slane %v15_v35, %v94_v36  ;;  %v2741_v63 = vld [vmem:[%s4050_s1 + $0x30] sm:$0xff] }
   0xd   :  { %v223_v15 = vsub.f32 %v3695_v13, %v222_v14 }
   0xf   :  { %3581 = vset.pattern.permute.xlu0 %v3642_v6  ;;  %3580 = vset.pattern.permute.xlu1 %v3641_v2  ;;  %v224_v16 = vand.u32 4294901760, %v223_v15 }
  0x10   :  { %77 = vperm.xlu0 %3581, %v16_v1   ;;  %36 = vperm.xlu1 %3580, %v18_v7   ;;  %v143_v1 = vsel %vm138_vm0, %v2740_v60, 0 }
  0x11   :  { %2971 = vmatprep.mubr.f32.mxu0 %v224_v16  ;;  %v3754_v10 = vand.u32 4294901760, %v143_v1 }
  0x14   :  { %85 = vperm.xlu0 %3581, %v18_v7   ;;  %64 = vperm.xlu1 %3580, %v22_v8   ;;  %v146_v7 = vsel %vm138_vm0, %v2741_v63, 0  ;;  %v2742_v8 = vld [vmem:[%s4050_s1 + $0x38] sm:$0xff] }
  0x15   :  { %v3760_v16 = vand.u32 4294901760, %v146_v7 }
  0x18   :  { %3584 = vset.pattern.permute.xlu0 %v3641_v2  ;;  %69 = vperm.xlu1 %3580, %v23_v9  }
  0x19   :  { %125 = vperm.xlu0 %3584, %v2744_v18  }
  0x1c   :  { %3582 = vset.pattern.permute.xlu1 %v3642_v6 }
  0x1d   :  { %89 = vperm.xlu1 %3582, %v19_v5   ;;  %781 = vperm.xlu0 %3584, %v2751_v20   ;;  %v3766_v20 = vsub.f32 %v143_v1, %v3754_v10  ;;  %v2748_v1 = vld [vmem:[%s4050_s1 + $0x48] sm:$0xff] }
  0x21   :  { %3583 = vset.pattern.permute.xlu1 %v3641_v2  ;;  %791 = vperm.xlu0 %3584, %v2753_v22  }
  0x22   :  { %120 = vperm.xlu1 %3583, %v2743_v17   ;;  %v149_v17 = vsel %vm138_vm0, %v2742_v8, 0 }
  0x25   :  { %1441 = vperm.xlu0 %3584, %v2759_v24   ;;  %v241_v24 = vsub.f32 %v146_v7, %v3760_v16 }
  0x26   :  { %130 = vperm.xlu1 %3583, %v2745_v19  }
  0x27   :  { %v242_v30 = vand.u32 4294901760, %v241_v24 }
  0x29   :  { %1451 = vperm.xlu0 %3584, %v2761_v26   ;;  %v232_v26 = vand.u32 4294901760, %v3766_v20 }
  0x2a   :  { %135 = vperm.xlu1 %3583, %v2746_v21  }
  0x2b   :  { %v233_v33 = vsub.f32 %v3766_v20, %v232_v26 }
  0x2d   :  { %2101 = vperm.xlu0 %3584, %v2767_v28  }
  0x2e   :  { %786 = vperm.xlu1 %3583, %v2752_v23   ;;  %v3769_v23 = vand.u32 4294901760, %v149_v17 }
  0x30   :  { %v251_v28 = vsub.f32 %v149_v17, %v3769_v23 }
  0x32   :  { %796 = vperm.xlu1 %3583, %v2754_v25   ;;  %v252_v36 = vand.u32 4294901760, %v251_v28 }
  0x36   :  { %1446 = vperm.xlu1 %3583, %v2760_v27  }
  0x3a   :  { %1456 = vperm.xlu1 %3583, %v2762_v29  }
  0x81   :  { %v55_v32 = vpop.permute.xlu1 %54 }
  0x82   :  { %v27_v34 = vpop.permute.xlu0 %26 }
  0x83   :  { %v48_v44 = vmul.f32 %v47_v37, %v27_v34 }
  0x85   :  { %v60_v38 = vpop.permute.xlu1 %59  ;;  %v72_v49 = vadd.f32 %v55_v32, %v48_v44  ;;  %v253_v44 = vsub.f32 %v251_v28, %v252_v36 }
  0x86   :  { %v32_v39 = vpop.permute.xlu0 %31 }
  0x87   :  { %v49_v40 = vmul.f32 %v47_v37, %v32_v39 }
  0x89   :  { %v73_v45 = vadd.f32 %v60_v38, %v49_v40  ;;  %v243_v38 = vsub.f32 %v241_v24, %v242_v30 }
  0x8a   :  { %v42_v42 = vpop.permute.xlu0 %41  ;;  %v82_v43 = vpop.permute.xlu1 %81 }
  0x8b   :  { %v97_v46 = vmul.f32 %v95_v41, %v82_v43  ;;  %v51_v62 = vmul.f32 %v47_v37, %v42_v42  ;;  %v234_v42 = vand.u32 4294901760, %v233_v33 }
  0x8d   :  { %v101_v47 = vadd.f32 %v97_v46, %v73_v45 }
  0x8f   :  { %v78_v48 = vpop.permute.xlu0 %77  ;;  %v37_v51 = vpop.permute.xlu1 %36  ;;  %3585 = vtanh.f32 %v101_v47  ;;  %v244_v47 = vand.u32 4294901760, %v243_v38 }
  0x90   :  { %v96_v50 = vmul.f32 %v95_v41, %v78_v48  ;;  %v50_v53 = vmul.f32 %v47_v37, %v37_v51 }
  0x92   :  { %v100_v52 = vadd.f32 %v96_v50, %v72_v49  ;;  %v254_v49 = vand.u32 4294901760, %v253_v44 }
  0x93   :  { %v86_v54 = vpop.permute.xlu0 %85  ;;  %v65_v55 = vpop.permute.xlu1 %64 }
  0x94   :  { %3587 = vtanh.f32 %v100_v52  ;;  %v98_v56 = vmul.f32 %v95_v41, %v86_v54  ;;  %v74_v57 = vadd.f32 %v65_v55, %v50_v53 }
  0x96   :  { %v102_v58 = vadd.f32 %v98_v56, %v74_v57 }
  0x97   :  { %v70_v59 = vpop.permute.xlu1 %69 }
  0x98   :  { %3589 = vtanh.f32 %v102_v58  ;;  %v75_v3 = vadd.f32 %v70_v59, %v51_v62  ;;  %v126_v63 = vpop.permute.xlu0 %125 }
  0x99   :  { %v3586_v61 = vpop.eup %3585 }
  0x9a   :  { %v155_v5 = vand.u32 4294901760, %v3586_v61 }
  0x9c   :  { %v90_v0 = vpop.permute.xlu1 %89  ;;  %v269_v19 = vsub.f32 %v3586_v61, %v155_v5 }
  0x9d   :  { %v99_v4 = vmul.f32 %v95_v41, %v90_v0 }
  0x9e   :  { %v3588_v2 = vpop.eup %3587  ;;  %v270_v25 = vand.u32 4294901760, %v269_v19 }
  0x9f   :  { %v152_v6 = vand.u32 4294901760, %v3588_v2  ;;  %v103_v9 = vadd.f32 %v99_v4, %v75_v3 }
  0xa0   :  { %v271_v31 = vsub.f32 %v269_v19, %v270_v25 }
  0xa1   :  { %v3756_v11 = vpack.c.bf16 %v155_v5, %v152_v6  ;;  %v3758_v15 = vsub.f32 %v3588_v2, %v152_v6  ;;  %3591 = vtanh.f32 %v103_v9  ;;  %v121_v61 = vpop.permute.xlu1 %120  ;;  %v2749_v5 = vld [vmem:[%s4050_s1 + $0x50] sm:$0xff]  ;;  %v803_v6 = vsel %vm138_vm0, %v2748_v1, 0 }
  0xa2   :  { %v3590_v18 = vpop.eup %3589  ;;  %v272_v40 = vand.u32 4294901760, %v271_v31  ;;  %v3821_v17 = vand.u32 4294901760, %v803_v6 }
  0xa3   :  { %3300 = vmatprep.subr.bf16.mxu0 %v3756_v11  ;;  %v158_v21 = vand.u32 4294901760, %v3590_v18  ;;  %v263_v22 = vand.u32 4294901760, %v3758_v15  ;;  %v3315_v53 = vpack.c.bf16 %v269_v19, %v3758_v15 }
  0xa4   :  { %3302 = vmatpush3.bf16.msra.mxu0 %v3756_v11 }
  0xa5   :  { %v264_v27 = vsub.f32 %v3758_v15, %v263_v22  ;;  %v276_v29 = vsub.f32 %v3590_v18, %v158_v21  ;;  %v3331_v55 = vpack.c.bf16 %v270_v25, %v263_v22  ;;  %v131_v62 = vpop.permute.xlu1 %130  ;;  %v2750_v15 = vld [vmem:[%s4050_s1 + $0x58] sm:$0xff] }
  0xa6   :  { %v809_v19 = vsel %vm138_vm0, %v2750_v15, 0  ;;  %v2757_v15 = vld [vmem:[%s4050_s1 + $0x70] sm:$0xff] }
  0xa7   :  { %v265_v35 = vand.u32 4294901760, %v264_v27  ;;  %v277_v37 = vand.u32 4294901760, %v276_v29 }
  0xa9   :  { %v3307_v43 = vpack.c.bf16 %v272_v40, %v265_v35  ;;  %v278_v45 = vsub.f32 %v276_v29, %v277_v37  ;;  %v136_v7 = vpop.permute.xlu1 %135 }
  0xab   :  { %v3592_v32 = vpop.eup %3591  ;;  %v279_v50 = vand.u32 4294901760, %v278_v45 }
  0xac   :  { %v161_v34 = vand.u32 4294901760, %v3592_v32 }
  0xae   :  { %v3303_v39 = vpack.c.bf16 %v161_v34, %v158_v21  ;;  %v283_v41 = vsub.f32 %v3592_v32, %v161_v34  ;;  %v3829_v21 = vand.u32 4294901760, %v809_v19 }
  0xb0   :  { %3304 = vmatprep.subr.bf16.mxu0 %v3303_v39  ;;  %v284_v46 = vand.u32 4294901760, %v283_v41  ;;  %v3319_v54 = vpack.c.bf16 %v283_v41, %v276_v29 }
  0xb1   :  { %3306 = vmatpush3.bf16.msra.mxu0 %v3303_v39 }
  0xb2   :  { %3308 = vmatprep.subr.bf16.mxu0 %v3307_v43  ;;  %v285_v48 = vsub.f32 %v283_v41, %v284_v46  ;;  %v3335_v56 = vpack.c.bf16 %v284_v46, %v277_v37 }
  0xb4   :  { %2972 = vmatmul.mubr.f32.vlgmr.msra.gmra.mrb[0].mxu0 %v234_v42  ;;  %v286_v51 = vand.u32 4294901760, %v285_v48 }
  0xb5   :  { %3310 = vmatpush3.bf16.msra.mxu0 %v3307_v43  ;;  %2974 = vmatprep.mubr.f32.mxu0 %v244_v47 }
  0xb6   :  { %v3311_v52 = vpack.c.bf16 %v286_v51, %v279_v50 }
  0xb8   :  { %2975 = vmatmul.mubr.f32.gmra.mrb[2].mxu0 %v254_v49  ;;  %3312 = vmatprep.subr.bf16.mxu0 %v3311_v52 }
  0xb9   :  { %3314 = vmatpush3.bf16.msra.mxu0 %v3311_v52  ;;  %2985 = vmatprep.mubr.f32.mxu0 %v3692_v12 }
  0xba   :  { %3316 = vmatprep.subr.bf16.mxu0 %v3315_v53 }
  0xbc   :  { %2986 = vmatmul.mubr.f32.vlgmr.msra.gmra.mrb[0].mxu0 %v3754_v10 }
  0xbd   :  { %3318 = vmatpush3.bf16.msra.mxu0 %v3315_v53  ;;  %2988 = vmatprep.mubr.f32.mxu0 %v3760_v16 }
  0xbe   :  { %3320 = vmatprep.subr.bf16.mxu0 %v3319_v54 }
  0xc0   :  { %2989 = vmatmul.mubr.f32.gmra.mrb[2].mxu0 %v3769_v23 }
  0xc1   :  { %3322 = vmatpush3.bf16.msra.mxu0 %v3319_v54  ;;  %2999 = vmatprep.mubr.f32.mxu0 %v3695_v13  ;;  %v2747_v13 = vld [vmem:[%s4050_s1 + $0x40] sm:$0xff] }
  0xc2   :  { %3324 = vmatprep.subr.bf16.mxu0 %v3756_v11 }
  0xc4   :  { %3000 = vmatmul.mubr.f32.vlgmr.msra.gmra.mrb[0].mxu0 %v3766_v20  ;;  %v3827_v20 = vsub.f32 %v803_v6, %v3821_v17  ;;  %v782_v6 = vpop.permute.xlu0 %781 }
  0xc5   :  { %3326 = vmatpush3.bf16.msra.mxu0 %v3756_v11  ;;  %3002 = vmatprep.mubr.f32.mxu0 %v241_v24 }
  0xc6   :  { %3328 = vmatprep.subr.bf16.mxu0 %v3303_v39 }
  0xc8   :  { %3003 = vmatmul.mubr.f32.gmra.mrb[2].mxu0 %v251_v28  ;;  %v3836_v28 = vsub.f32 %v809_v19, %v3829_v21  ;;  %v792_v19 = vpop.permute.xlu0 %791 }
  0xc9   :  { %3330 = vmatpush3.bf16.msra.mxu0 %v3303_v39  ;;  %3013 = vmatprep.mubr.f32.mxu0 %v222_v14  ;;  %v800_v14 = vsel %vm138_vm0, %v2747_v13, 0 }
  0xca   :  { %3332 = vmatprep.subr.bf16.mxu0 %v3331_v55  ;;  %v3801_v57 = vand.u32 4294901760, %v800_v14  ;;  %v912_v40 = vand.u32 4294901760, %v3836_v28 }
  0xcc   :  { %3014 = vmatmul.mubr.f32.vlgmr.msra.gmra.mrb[0].mxu0 %v232_v26  ;;  %v3804_v58 = vsub.f32 %v800_v14, %v3801_v57  ;;  %v892_v26 = vand.u32 4294901760, %v3827_v20  ;;  %v913_v53 = vsub.f32 %v3836_v28, %v912_v40 }
  0xcd   :  { %3334 = vmatpush3.bf16.msra.mxu0 %v3331_v55  ;;  %3016 = vmatprep.mubr.f32.mxu0 %v242_v30 }
  0xce   :  { %3336 = vmatprep.subr.bf16.mxu0 %v3335_v56  ;;  %v882_v59 = vand.u32 4294901760, %v3804_v58 }
  0xd0   :  { %3017 = vmatmul.mubr.f32.gmra.mrb[2].mxu0 %v252_v36  ;;  %v893_v36 = vsub.f32 %v3827_v20, %v892_v26 }
  0xd1   :  { %3338 = vmatpush3.bf16.msra.mxu0 %v3335_v56  ;;  %3027 = vmatprep.mubr.f32.mxu0 %v3692_v12 }
  0xd2   :  { %3340 = vmatprep.subr.bf16.mxu0 %v3756_v11  ;;  %v894_v49 = vand.u32 4294901760, %v893_v36 }
  0xd4   :  { %3028 = vmatmul.mubr.f32.vlgmr.msra.gmra.mrb[0].mxu0 %v3754_v10 }
  0xd5   :  { %3342 = vmatpush3.bf16.msra.mxu0 %v3756_v11  ;;  %3030 = vmatprep.mubr.f32.mxu0 %v3760_v16  ;;  %v806_v11 = vsel %vm138_vm0, %v2749_v5, 0  ;;  %v787_v5 = vpop.permute.xlu1 %786 }
  0xd6   :  { %3344 = vmatprep.subr.bf16.mxu0 %v3303_v39  ;;  %v3823_v18 = vand.u32 4294901760, %v806_v11 }
  0xd8   :  { %3031 = vmatmul.mubr.f32.gmra.mrb[2].mxu0 %v3769_v23  ;;  %v3832_v22 = vsub.f32 %v806_v11, %v3823_v18 }
  0xd9   :  { %3346 = vmatpush3.bf16.msra.mxu0 %v3303_v39  ;;  %3041 = vmatprep.mubr.f32.mxu0 %v3692_v12  ;;  %v883_v12 = vsub.f32 %v3804_v58, %v882_v59 }
  0xda   :  { %v902_v30 = vand.u32 4294901760, %v3832_v22 }
  0xdb   :  { %v884_v60 = vand.u32 4294901760, %v883_v12 }
  0xdc   :  { %3042 = vmatmul.mubr.f32.vlgmr.msra.gmra.mrb[0].mxu0 %v3754_v10  ;;  %v903_v43 = vsub.f32 %v3832_v22, %v902_v30 }
  0xdd   :  { %3044 = vmatprep.mubr.f32.mxu0 %v3760_v16  ;;  %3055 = vmatprep.mubr.f32.mxu1 %v884_v60 }
  0xde   :  { %v904_v56 = vand.u32 4294901760, %v903_v43 }
  0xe0   :  { %3045 = vmatmul.mubr.f32.gmra.mrb[2].mxu0 %v3769_v23 }
 0x1af   :  { %v3043_v0 = vpop.f32.mrb[0].mxu0 }
 0x1b0   :  { %v3491_v2 = vadd.f32 %v3043_v0, %v126_v63  ;;  %v743_v3 = vpop.f32.mrb[1].mxu0 }
 0x1b1   :  { %v3492_v4 = vadd.f32 %v743_v3, %v121_v61 }
 0x1b2   :  { %3593 = vtanh.f32 %v3491_v2 }
 0x1b3   :  { %3595 = vtanh.f32 %v3492_v4  ;;  %v3046_v8 = vpop.f32.mrb[2].mxu0 }
 0x1b4   :  { %v3493_v9 = vadd.f32 %v3046_v8, %v136_v7  ;;  %v755_v10 = vpop.f32.mrb[3].mxu0  ;;  %v2756_v8 = vld [vmem:[%s4050_s1 + $0x68] sm:$0xff] }
 0x1b5   :  { %v3494_v16 = vadd.f32 %v755_v10, %v131_v62  ;;  %v914_v62 = vand.u32 4294901760, %v913_v53 }
 0x1b6   :  { %3597 = vtanh.f32 %v3493_v9 }
 0x1b7   :  { %3599 = vtanh.f32 %v3494_v16  ;;  %v1463_v16 = vsel %vm138_vm0, %v2756_v8, 0 }
 0x1bc   :  { %v3594_v23 = vpop.eup %3593 }
 0x1bd   :  { %v3596_v24 = vpop.eup %3595  ;;  %v815_v25 = vand.u32 4294901760, %v3594_v23 }
 0x1be   :  { %v812_v27 = vand.u32 4294901760, %v3596_v24 }
 0x1bf   :  { %v929_v29 = vsub.f32 %v3594_v23, %v815_v25  ;;  %v2758_v23 = vld [vmem:[%s4050_s1 + $0x78] sm:$0xff] }
 0x1c0   :  { %v3598_v31 = vpop.eup %3597  ;;  %v3839_v32 = vpack.c.bf16 %v815_v25, %v812_v27  ;;  %v922_v33 = vsub.f32 %v3596_v24, %v812_v27  ;;  %v3901_v25 = vand.u32 4294901760, %v1463_v16  ;;  %v1469_v27 = vsel %vm138_vm0, %v2758_v23, 0  ;;  %v2765_v23 = vld [vmem:[%s4050_s1 + $0x90] sm:$0xff] }
 0x1c1   :  { %v3600_v34 = vpop.eup %3599  ;;  %v821_v35 = vand.u32 4294901760, %v3598_v31  ;;  %v930_v37 = vand.u32 4294901760, %v929_v29 }
 0x1c2   :  { %v818_v38 = vand.u32 4294901760, %v3600_v34  ;;  %3348 = vmatprep.subr.bf16.mxu1 %v3839_v32  ;;  %v923_v39 = vand.u32 4294901760, %v922_v33  ;;  %v3363_v41 = vpack.c.bf16 %v929_v29, %v922_v33 }
 0x1c3   :  { %3350 = vmatpush3.bf16.msra.mxu1 %v3839_v32  ;;  %v931_v42 = vsub.f32 %v929_v29, %v930_v37  ;;  %v943_v44 = vsub.f32 %v3598_v31, %v821_v35  ;;  %v3909_v29 = vand.u32 4294901760, %v1469_v27 }
 0x1c4   :  { %v3351_v45 = vpack.c.bf16 %v821_v35, %v818_v38  ;;  %v924_v46 = vsub.f32 %v922_v33, %v923_v39  ;;  %v936_v47 = vsub.f32 %v3600_v34, %v818_v38  ;;  %v3379_v48 = vpack.c.bf16 %v930_v37, %v923_v39 }
 0x1c5   :  { %v932_v50 = vand.u32 4294901760, %v931_v42  ;;  %v944_v51 = vand.u32 4294901760, %v943_v44  ;;  %v3916_v36 = vsub.f32 %v1469_v27, %v3909_v29 }
 0x1c6   :  { %3352 = vmatprep.subr.bf16.mxu1 %v3351_v45  ;;  %v925_v52 = vand.u32 4294901760, %v924_v46  ;;  %v937_v54 = vand.u32 4294901760, %v936_v47  ;;  %v3367_v55 = vpack.c.bf16 %v943_v44, %v936_v47 }
 0x1c7   :  { %3354 = vmatpush3.bf16.msra.mxu1 %v3351_v45  ;;  %v945_v13 = vsub.f32 %v943_v44, %v944_v51 }
 0x1c8   :  { %v3355_v14 = vpack.c.bf16 %v932_v50, %v925_v52  ;;  %v938_v12 = vsub.f32 %v936_v47, %v937_v54  ;;  %v3383_v60 = vpack.c.bf16 %v944_v51, %v937_v54 }
 0x1c9   :  { %v946_v61 = vand.u32 4294901760, %v945_v13 }
 0x1ca   :  { %3056 = vmatmul.mubr.f32.vlgmr.msra.gmra.mrb[0].mxu1 %v894_v49  ;;  %3356 = vmatprep.subr.bf16.mxu1 %v3355_v14  ;;  %v939_v63 = vand.u32 4294901760, %v938_v12 }
 0x1cb   :  { %3358 = vmatpush3.bf16.msra.mxu1 %v3355_v14  ;;  %3058 = vmatprep.mubr.f32.mxu1 %v904_v56 }
 0x1cc   :  { %v3359_v0 = vpack.c.bf16 %v946_v61, %v939_v63 }
 0x1ce   :  { %3059 = vmatmul.mubr.f32.gmra.mrb[2].mxu1 %v914_v62  ;;  %3360 = vmatprep.subr.bf16.mxu1 %v3359_v0 }
 0x1cf   :  { %3362 = vmatpush3.bf16.msra.mxu1 %v3359_v0  ;;  %3069 = vmatprep.mubr.f32.mxu1 %v3801_v57 }
 0x1d0   :  { %3364 = vmatprep.subr.bf16.mxu1 %v3363_v41 }
 0x1d2   :  { %3070 = vmatmul.mubr.f32.vlgmr.msra.gmra.mrb[0].mxu1 %v3821_v17 }
 0x1d3   :  { %3366 = vmatpush3.bf16.msra.mxu1 %v3363_v41  ;;  %3072 = vmatprep.mubr.f32.mxu1 %v3823_v18 }
 0x1d4   :  { %3368 = vmatprep.subr.bf16.mxu1 %v3367_v55 }
 0x1d6   :  { %3073 = vmatmul.mubr.f32.gmra.mrb[2].mxu1 %v3829_v21 }
 0x1d7   :  { %3370 = vmatpush3.bf16.msra.mxu1 %v3367_v55  ;;  %3083 = vmatprep.mubr.f32.mxu1 %v3804_v58  ;;  %v2755_v58 = vld [vmem:[%s4050_s1 + $0x60] sm:$0xff] }
 0x1d8   :  { %3372 = vmatprep.subr.bf16.mxu1 %v3839_v32 }
 0x1da   :  { %3084 = vmatmul.mubr.f32.vlgmr.msra.gmra.mrb[0].mxu1 %v3827_v20 }
 0x1db   :  { %3374 = vmatpush3.bf16.msra.mxu1 %v3839_v32  ;;  %3086 = vmatprep.mubr.f32.mxu1 %v3832_v22  ;;  %v1466_v22 = vsel %vm138_vm0, %v2757_v15, 0 }
 0x1dc   :  { %3376 = vmatprep.subr.bf16.mxu1 %v3351_v45 }
 0x1de   :  { %3087 = vmatmul.mubr.f32.gmra.mrb[2].mxu1 %v3836_v28  ;;  %v3907_v28 = vsub.f32 %v1463_v16, %v3901_v25 }
 0x1df   :  { %3378 = vmatpush3.bf16.msra.mxu1 %v3351_v45  ;;  %3097 = vmatprep.mubr.f32.mxu1 %v882_v59  ;;  %v1460_v59 = vsel %vm138_vm0, %v2755_v58, 0 }
 0x1e0   :  { %3380 = vmatprep.subr.bf16.mxu1 %v3379_v48  ;;  %v3881_v1 = vand.u32 4294901760, %v1460_v59  ;;  %v1552_v34 = vand.u32 4294901760, %v3907_v28 }
 0x1e2   :  { %3098 = vmatmul.mubr.f32.vlgmr.msra.gmra.mrb[0].mxu1 %v892_v26  ;;  %v3884_v2 = vsub.f32 %v1460_v59, %v3881_v1  ;;  %v3903_v26 = vand.u32 4294901760, %v1466_v22  ;;  %v1553_v44 = vsub.f32 %v3907_v28, %v1552_v34 }
 0x1e3   :  { %3382 = vmatpush3.bf16.msra.mxu1 %v3379_v48  ;;  %3100 = vmatprep.mubr.f32.mxu1 %v902_v30  ;;  %v1572_v48 = vand.u32 4294901760, %v3916_v36 }
 0x1e4   :  { %3384 = vmatprep.subr.bf16.mxu1 %v3383_v60  ;;  %v1542_v3 = vand.u32 4294901760, %v3884_v2  ;;  %v3912_v30 = vsub.f32 %v1466_v22, %v3903_v26  ;;  %v1554_v13 = vand.u32 4294901760, %v1553_v44 }
 0x1e5   :  { %v1573_v61 = vsub.f32 %v3916_v36, %v1572_v48 }
 0x1e6   :  { %3101 = vmatmul.mubr.f32.gmra.mrb[2].mxu1 %v912_v40  ;;  %v1562_v38 = vand.u32 4294901760, %v3912_v30 }
 0x1e7   :  { %3386 = vmatpush3.bf16.msra.mxu1 %v3383_v60  ;;  %3111 = vmatprep.mubr.f32.mxu1 %v3801_v57 }
 0x1e8   :  { %3388 = vmatprep.subr.bf16.mxu1 %v3839_v32  ;;  %v1563_v51 = vsub.f32 %v3912_v30, %v1562_v38 }
 0x1ea   :  { %3112 = vmatmul.mubr.f32.vlgmr.msra.gmra.mrb[0].mxu1 %v3821_v17  ;;  %v1564_v0 = vand.u32 4294901760, %v1563_v51 }
 0x1eb   :  { %3390 = vmatpush3.bf16.msra.mxu1 %v3839_v32  ;;  %3114 = vmatprep.mubr.f32.mxu1 %v3823_v18 }
 0x1ec   :  { %3392 = vmatprep.subr.bf16.mxu1 %v3351_v45 }
 0x1ee   :  { %3115 = vmatmul.mubr.f32.gmra.mrb[2].mxu1 %v3829_v21 }
 0x1ef   :  { %3394 = vmatpush3.bf16.msra.mxu1 %v3351_v45  ;;  %3125 = vmatprep.mubr.f32.mxu1 %v3801_v57  ;;  %v1543_v57 = vsub.f32 %v3884_v2, %v1542_v3 }
 0x1f1   :  { %v1544_v4 = vand.u32 4294901760, %v1543_v57 }
 0x1f2   :  { %3126 = vmatmul.mubr.f32.vlgmr.msra.gmra.mrb[0].mxu1 %v3821_v17  ;;  %v797_v17 = vpop.permute.xlu1 %796 }
 0x1f3   :  { %3128 = vmatprep.mubr.f32.mxu1 %v3823_v18  ;;  %3139 = vmatprep.mubr.f32.mxu0 %v1544_v4 }
 0x1f6   :  { %3129 = vmatmul.mubr.f32.gmra.mrb[2].mxu1 %v3829_v21  ;;  %v1447_v16 = vpop.permute.xlu1 %1446 }
 0x2c5   :  { %v3127_v7 = vpop.f32.mrb[0].mxu1 }
 0x2c6   :  { %v3495_v9 = vadd.f32 %v3127_v7, %v787_v5  ;;  %v1403_v10 = vpop.f32.mrb[1].mxu1 }
 0x2c7   :  { %v3496_v11 = vadd.f32 %v1403_v10, %v782_v6  ;;  %v1574_v6 = vand.u32 4294901760, %v1573_v61 }
 0x2c8   :  { %3601 = vtanh.f32 %v3495_v9 }
 0x2c9   :  { %3603 = vtanh.f32 %v3496_v11  ;;  %v3130_v18 = vpop.f32.mrb[2].mxu1 }
 0x2ca   :  { %v3497_v20 = vadd.f32 %v3130_v18, %v797_v17  ;;  %v1415_v21 = vpop.f32.mrb[3].mxu1  ;;  %v1442_v17 = vpop.permute.xlu0 %1441 }
 0x2cb   :  { %v3498_v24 = vadd.f32 %v1415_v21, %v792_v19  ;;  %v2764_v19 = vld [vmem:[%s4050_s1 + $0x88] sm:$0xff] }
 0x2cc   :  { %3605 = vtanh.f32 %v3497_v20 }
 0x2cd   :  { %3607 = vtanh.f32 %v3498_v24  ;;  %v2120_v24 = vsel %vm138_vm0, %v2764_v19, 0 }
 0x2ce   :  { %v1452_v27 = vpop.permute.xlu0 %1451 }
 0x2d2   :  { %v3602_v31 = vpop.eup %3601 }
 0x2d3   :  { %v3604_v32 = vpop.eup %3603  ;;  %v1475_v33 = vand.u32 4294901760, %v3602_v31 }
 0x2d4   :  { %v1472_v35 = vand.u32 4294901760, %v3604_v32 }
 0x2d5   :  { %v1589_v37 = vsub.f32 %v3602_v31, %v1475_v33  ;;  %v2766_v31 = vld [vmem:[%s4050_s1 + $0x98] sm:$0xff] }
 0x2d6   :  { %v3606_v39 = vpop.eup %3605  ;;  %v3919_v40 = vpack.c.bf16 %v1475_v33, %v1472_v35  ;;  %v1582_v41 = vsub.f32 %v3604_v32, %v1472_v35  ;;  %v3981_v33 = vand.u32 4294901760, %v2120_v24  ;;  %v2126_v35 = vsel %vm138_vm0, %v2766_v31, 0 }
 0x2d7   :  { %v3608_v42 = vpop.eup %3607  ;;  %v1481_v43 = vand.u32 4294901760, %v3606_v39  ;;  %v1590_v45 = vand.u32 4294901760, %v1589_v37 }
 0x2d8   :  { %v1478_v46 = vand.u32 4294901760, %v3608_v42  ;;  %3396 = vmatprep.subr.bf16.mxu0 %v3919_v40  ;;  %v1583_v47 = vand.u32 4294901760, %v1582_v41  ;;  %v3411_v49 = vpack.c.bf16 %v1589_v37, %v1582_v41 }
 0x2d9   :  { %3398 = vmatpush3.bf16.msra.mxu0 %v3919_v40  ;;  %v1591_v50 = vsub.f32 %v1589_v37, %v1590_v45  ;;  %v1603_v52 = vsub.f32 %v3606_v39, %v1481_v43  ;;  %v3989_v37 = vand.u32 4294901760, %v2126_v35 }
 0x2da   :  { %v3399_v53 = vpack.c.bf16 %v1481_v43, %v1478_v46  ;;  %v1584_v54 = vsub.f32 %v1582_v41, %v1583_v47  ;;  %v1596_v55 = vsub.f32 %v3608_v42, %v1478_v46  ;;  %v3427_v56 = vpack.c.bf16 %v1590_v45, %v1583_v47 }
 0x2db   :  { %v1592_v14 = vand.u32 4294901760, %v1591_v50  ;;  %v1604_v12 = vand.u32 4294901760, %v1603_v52  ;;  %v3996_v44 = vsub.f32 %v2126_v35, %v3989_v37 }
 0x2dc   :  { %3400 = vmatprep.subr.bf16.mxu0 %v3399_v53  ;;  %v1585_v60 = vand.u32 4294901760, %v1584_v54  ;;  %v1597_v62 = vand.u32 4294901760, %v1596_v55  ;;  %v3415_v63 = vpack.c.bf16 %v1603_v52, %v1596_v55 }
 0x2dd   :  { %3402 = vmatpush3.bf16.msra.mxu0 %v3399_v53  ;;  %v1605_v58 = vsub.f32 %v1603_v52, %v1604_v12 }
 0x2de   :  { %v3403_v59 = vpack.c.bf16 %v1592_v14, %v1585_v60  ;;  %v1598_v57 = vsub.f32 %v1596_v55, %v1597_v62  ;;  %v3431_v4 = vpack.c.bf16 %v1604_v12, %v1597_v62 }
 0x2df   :  { %v1606_v5 = vand.u32 4294901760, %v1605_v58 }
 0x2e0   :  { %3140 = vmatmul.mubr.f32.vlgmr.msra.gmra.mrb[4].mxu0 %v1554_v13  ;;  %3404 = vmatprep.subr.bf16.mxu0 %v3403_v59  ;;  %v1599_v7 = vand.u32 4294901760, %v1598_v57 }
 0x2e1   :  { %3406 = vmatpush3.bf16.msra.mxu0 %v3403_v59  ;;  %3142 = vmatprep.mubr.f32.mxu0 %v1564_v0 }
 0x2e2   :  { %v3407_v8 = vpack.c.bf16 %v1606_v5, %v1599_v7 }
 0x2e4   :  { %3143 = vmatmul.mubr.f32.gmra.mrb[6].mxu0 %v1574_v6  ;;  %3408 = vmatprep.subr.bf16.mxu0 %v3407_v8 }
 0x2e5   :  { %3410 = vmatpush3.bf16.msra.mxu0 %v3407_v8  ;;  %3153 = vmatprep.mubr.f32.mxu0 %v3881_v1 }
 0x2e6   :  { %3412 = vmatprep.subr.bf16.mxu0 %v3411_v49 }
 0x2e8   :  { %3154 = vmatmul.mubr.f32.vlgmr.msra.gmra.mrb[4].mxu0 %v3901_v25 }
 0x2e9   :  { %3414 = vmatpush3.bf16.msra.mxu0 %v3411_v49  ;;  %3156 = vmatprep.mubr.f32.mxu0 %v3903_v26 }
 0x2ea   :  { %3416 = vmatprep.subr.bf16.mxu0 %v3415_v63 }
 0x2ec   :  { %3157 = vmatmul.mubr.f32.gmra.mrb[6].mxu0 %v3909_v29 }
 0x2ed   :  { %3418 = vmatpush3.bf16.msra.mxu0 %v3415_v63  ;;  %3167 = vmatprep.mubr.f32.mxu0 %v3884_v2  ;;  %v2763_v2 = vld [vmem:[%s4050_s1 + $0x80] sm:$0xff]  ;;  %s3643_s1 = smov [#allocation2]  }
 0x2ee   :  { %3420 = vmatprep.subr.bf16.mxu0 %v3919_v40  ;;  %s2731_s2 = sshll.u32 %s3643_s1, 4  ;;  %s2732_s2 = int_to_ptr.vmem [resolvable:$true] %s2731_s2 }
 0x2ef   :  { %s3617_s4 = scalar_lea.vmem %s2732_s2, 16  ;;  %s3621_s5 = scalar_lea.vmem %s2732_s2, 32 }
 0x2f0   :  { %3168 = vmatmul.mubr.f32.vlgmr.msra.gmra.mrb[4].mxu0 %v3907_v28  ;;  %p3618_p0 = scmp.ne.s32.totalorder %s2732_s2, %s3617_s4  ;;  %p3622_p1 = scmp.lt.s32.totalorder %s2732_s2, %s2732_s2 }
 0x2f1   :  { %3422 = vmatpush3.bf16.msra.mxu0 %v3919_v40  ;;  %3170 = vmatprep.mubr.f32.mxu0 %v3912_v30  ;;  %v2123_v30 = vsel %vm138_vm0, %v2765_v23, 0  ;;  %p3623_p2 = scmp.lt.s32.totalorder %s3621_s5, %s3617_s4 }
 0x2f2   :  { %3424 = vmatprep.subr.bf16.mxu0 %v3399_v53 }
 0x2f3   :  { %p3624_p3 = por %p3623_p2, %p3622_p1 }
 0x2f4   :  { %3171 = vmatmul.mubr.f32.gmra.mrb[6].mxu0 %v3916_v36  ;;  %v3987_v36 = vsub.f32 %v2120_v24, %v3981_v33 }
 0x2f5   :  { %3426 = vmatpush3.bf16.msra.mxu0 %v3399_v53  ;;  %3181 = vmatprep.mubr.f32.mxu0 %v1542_v3  ;;  %v2117_v3 = vsel %vm138_vm0, %v2763_v2, 0  ;;  %p3625_p4 = pnand %p3624_p3, %p3618_p0 }
 0x2f6   :  { %3428 = vmatprep.subr.bf16.mxu0 %v3427_v56  ;;  %v3961_v9 = vand.u32 4294901760, %v2117_v3  ;;  %v2209_v42 = vand.u32 4294901760, %v3987_v36 }
 0x2f8   :  { %3182 = vmatmul.mubr.f32.vlgmr.msra.gmra.mrb[4].mxu0 %v1552_v34  ;;  %v3964_v10 = vsub.f32 %v2117_v3, %v3961_v9  ;;  %v3983_v34 = vand.u32 4294901760, %v2123_v30  ;;  %v2210_v52 = vsub.f32 %v3987_v36, %v2209_v42 }
 0x2f9   :  { %3430 = vmatpush3.bf16.msra.mxu0 %v3427_v56  ;;  %3184 = vmatprep.mubr.f32.mxu0 %v1562_v38  ;;  %v2227_v56 = vand.u32 4294901760, %v3996_v44 }
 0x2fa   :  { %3432 = vmatprep.subr.bf16.mxu0 %v3431_v4  ;;  %v2199_v11 = vand.u32 4294901760, %v3964_v10  ;;  %v3992_v38 = vsub.f32 %v2123_v30, %v3983_v34  ;;  %v2211_v58 = vand.u32 4294901760, %v2210_v52 }
 0x2fb   :  { %v2228_v5 = vsub.f32 %v3996_v44, %v2227_v56 }
 0x2fc   :  { %3185 = vmatmul.mubr.f32.gmra.mrb[6].mxu0 %v1572_v48  ;;  %v2218_v46 = vand.u32 4294901760, %v3992_v38 }
 0x2fd   :  { %3434 = vmatpush3.bf16.msra.mxu0 %v3431_v4  ;;  %3195 = vmatprep.mubr.f32.mxu0 %v3881_v1 }
 0x2fe   :  { %3436 = vmatprep.subr.bf16.mxu0 %v3919_v40  ;;  %v2219_v12 = vsub.f32 %v3992_v38, %v2218_v46 }
 0x300   :  { %3196 = vmatmul.mubr.f32.vlgmr.msra.gmra.mrb[4].mxu0 %v3901_v25  ;;  %v2220_v8 = vand.u32 4294901760, %v2219_v12 }
 0x301   :  { %3438 = vmatpush3.bf16.msra.mxu0 %v3919_v40  ;;  %3198 = vmatprep.mubr.f32.mxu0 %v3903_v26 }
 0x302   :  { %3440 = vmatprep.subr.bf16.mxu0 %v3399_v53 }
 0x304   :  { %3199 = vmatmul.mubr.f32.gmra.mrb[6].mxu0 %v3909_v29 }
 0x305   :  { %3442 = vmatpush3.bf16.msra.mxu0 %v3399_v53  ;;  %3209 = vmatprep.mubr.f32.mxu0 %v3881_v1  ;;  %v2200_v1 = vsub.f32 %v3964_v10, %v2199_v11 }
 0x307   :  { %v2201_v15 = vand.u32 4294901760, %v2200_v1 }
 0x308   :  { %3210 = vmatmul.mubr.f32.vlgmr.msra.gmra.mrb[4].mxu0 %v3901_v25  ;;  %v1457_v25 = vpop.permute.xlu1 %1456 }
 0x309   :  { %3212 = vmatprep.mubr.f32.mxu0 %v3903_v26  ;;  %3223 = vmatprep.mubr.f32.mxu1 %v2201_v15 }
 0x30c   :  { %3213 = vmatmul.mubr.f32.gmra.mrb[6].mxu0 %v3909_v29 }
 0x3db   :  { %v3211_v18 = vpop.f32.mrb[4].mxu0 }
 0x3dc   :  { %v3499_v20 = vadd.f32 %v3211_v18, %v1447_v16  ;;  %v2063_v21 = vpop.f32.mrb[5].mxu0 }
 0x3dd   :  { %v3500_v22 = vadd.f32 %v2063_v21, %v1442_v17  ;;  %v2229_v17 = vand.u32 4294901760, %v2228_v5 }
 0x3de   :  { %3609 = vtanh.f32 %v3499_v20 }
 0x3df   :  { %3611 = vtanh.f32 %v3500_v22  ;;  %v3214_v26 = vpop.f32.mrb[6].mxu0 }
 0x3e0   :  { %v3501_v28 = vadd.f32 %v3214_v26, %v1457_v25  ;;  %v2075_v29 = vpop.f32.mrb[7].mxu0 }
 0x3e1   :  { %v3502_v32 = vadd.f32 %v2075_v29, %v1452_v27 }
 0x3e2   :  { %3613 = vtanh.f32 %v3501_v28 }
 0x3e3   :  { %3615 = vtanh.f32 %v3502_v32 }
 0x3e8   :  { %v3610_v39 = vpop.eup %3609 }
 0x3e9   :  { %v3612_v40 = vpop.eup %3611  ;;  %v2132_v41 = vand.u32 4294901760, %v3610_v39 }
 0x3ea   :  { %v2129_v43 = vand.u32 4294901760, %v3612_v40 }
 0x3eb   :  { %v2243_v45 = vsub.f32 %v3610_v39, %v2132_v41 }
 0x3ec   :  { %v3614_v47 = vpop.eup %3613  ;;  %v3999_v48 = vpack.c.bf16 %v2132_v41, %v2129_v43  ;;  %v2236_v49 = vsub.f32 %v3612_v40, %v2129_v43 }
 0x3ed   :  { %v3616_v50 = vpop.eup %3615  ;;  %v2138_v51 = vand.u32 4294901760, %v3614_v47  ;;  %v2244_v53 = vand.u32 4294901760, %v2243_v45 }
 0x3ee   :  { %v2135_v54 = vand.u32 4294901760, %v3616_v50  ;;  %3444 = vmatprep.subr.bf16.mxu1 %v3999_v48  ;;  %v2237_v55 = vand.u32 4294901760, %v2236_v49  ;;  %v3459_v13 = vpack.c.bf16 %v2243_v45, %v2236_v49 }
 0x3ef   :  { %3446 = vmatpush3.bf16.msra.mxu1 %v3999_v48  ;;  %v2245_v14 = vsub.f32 %v2243_v45, %v2244_v53  ;;  %v2257_v60 = vsub.f32 %v3614_v47, %v2138_v51 }
 0x3f0   :  { %v3447_v61 = vpack.c.bf16 %v2138_v51, %v2135_v54  ;;  %v2238_v62 = vsub.f32 %v2236_v49, %v2237_v55  ;;  %v2250_v63 = vsub.f32 %v3616_v50, %v2135_v54  ;;  %v3475_v0 = vpack.c.bf16 %v2244_v53, %v2237_v55 }
 0x3f1   :  { %v2246_v59 = vand.u32 4294901760, %v2245_v14  ;;  %v2258_v57 = vand.u32 4294901760, %v2257_v60 }
 0x3f2   :  { %3448 = vmatprep.subr.bf16.mxu1 %v3447_v61  ;;  %v2239_v4 = vand.u32 4294901760, %v2238_v62  ;;  %v2251_v6 = vand.u32 4294901760, %v2250_v63  ;;  %v3463_v7 = vpack.c.bf16 %v2257_v60, %v2250_v63 }
 0x3f3   :  { %3450 = vmatpush3.bf16.msra.mxu1 %v3447_v61  ;;  %v2259_v2 = vsub.f32 %v2257_v60, %v2258_v57 }
 0x3f4   :  { %v3451_v3 = vpack.c.bf16 %v2246_v59, %v2239_v4  ;;  %v2252_v1 = vsub.f32 %v2250_v63, %v2251_v6  ;;  %v3479_v15 = vpack.c.bf16 %v2258_v57, %v2251_v6 }
 0x3f5   :  { %v2260_v16 = vand.u32 4294901760, %v2259_v2 }
 0x3f6   :  { %3224 = vmatmul.mubr.f32.vlgmr.msra.gmra.mrb[4].mxu1 %v2211_v58  ;;  %3452 = vmatprep.subr.bf16.mxu1 %v3451_v3  ;;  %v2253_v18 = vand.u32 4294901760, %v2252_v1 }
 0x3f7   :  { %3454 = vmatpush3.bf16.msra.mxu1 %v3451_v3  ;;  %3226 = vmatprep.mubr.f32.mxu1 %v2220_v8 }
 0x3f8   :  { %v3455_v19 = vpack.c.bf16 %v2260_v16, %v2253_v18 }
 0x3fa   :  { %3227 = vmatmul.mubr.f32.gmra.mrb[6].mxu1 %v2229_v17  ;;  %3456 = vmatprep.subr.bf16.mxu1 %v3455_v19 }
 0x3fb   :  { %3458 = vmatpush3.bf16.msra.mxu1 %v3455_v19  ;;  %3237 = vmatprep.mubr.f32.mxu1 %v3961_v9 }
 0x3fc   :  { %3460 = vmatprep.subr.bf16.mxu1 %v3459_v13 }
 0x3fe   :  { %3238 = vmatmul.mubr.f32.vlgmr.msra.gmra.mrb[4].mxu1 %v3981_v33 }
 0x3ff   :  { %3462 = vmatpush3.bf16.msra.mxu1 %v3459_v13  ;;  %3240 = vmatprep.mubr.f32.mxu1 %v3983_v34 }
 0x400   :  { %3464 = vmatprep.subr.bf16.mxu1 %v3463_v7 }
 0x402   :  { %3241 = vmatmul.mubr.f32.gmra.mrb[8].mxu1 %v3989_v37 }
 0x403   :  { %3466 = vmatpush3.bf16.msra.mxu1 %v3463_v7  ;;  %3251 = vmatprep.mubr.f32.mxu1 %v3964_v10 }
 0x404   :  { %3468 = vmatprep.subr.bf16.mxu1 %v3999_v48 }
 0x406   :  { %3252 = vmatmul.mubr.f32.vlgmr.msra.gmra.mrb[4].mxu1 %v3987_v36 }
 0x407   :  { %3470 = vmatpush3.bf16.msra.mxu1 %v3999_v48  ;;  %3254 = vmatprep.mubr.f32.mxu1 %v3992_v38 }
 0x408   :  { %3472 = vmatprep.subr.bf16.mxu1 %v3447_v61 }
 0x40a   :  { %3255 = vmatmul.mubr.f32.gmra.mrb[10].mxu1 %v3996_v44 }
 0x40b   :  { %3474 = vmatpush3.bf16.msra.mxu1 %v3447_v61  ;;  %3265 = vmatprep.mubr.f32.mxu1 %v2199_v11 }
 0x40c   :  { %3476 = vmatprep.subr.bf16.mxu1 %v3475_v0 }
 0x40e   :  { %3266 = vmatmul.mubr.f32.vlgmr.msra.gmra.mrb[4].mxu1 %v2209_v42 }
 0x40f   :  { %3478 = vmatpush3.bf16.msra.mxu1 %v3475_v0  ;;  %3268 = vmatprep.mubr.f32.mxu1 %v2218_v46 }
 0x410   :  { %3480 = vmatprep.subr.bf16.mxu1 %v3479_v15 }
 0x412   :  { %3269 = vmatmul.mubr.f32.gmra.mrb[12].mxu1 %v2227_v56 }
 0x413   :  { %3482 = vmatpush3.bf16.msra.mxu1 %v3479_v15  ;;  %3279 = vmatprep.mubr.f32.mxu1 %v3961_v9 }
 0x414   :  { %3484 = vmatprep.subr.bf16.mxu1 %v3999_v48 }
 0x416   :  { %3280 = vmatmul.mubr.f32.vlgmr.msra.gmra.mrb[4].mxu1 %v3981_v33 }
 0x417   :  { %3486 = vmatpush3.bf16.msra.mxu1 %v3999_v48  ;;  %3282 = vmatprep.mubr.f32.mxu1 %v3983_v34 }
 0x418   :  { %3488 = vmatprep.subr.bf16.mxu1 %v3447_v61 }
 0x41a   :  { %3283 = vmatmul.mubr.f32.gmra.mrb[14].mxu1 %v3989_v37 }
 0x41b   :  { %3490 = vmatpush3.bf16.msra.mxu1 %v3447_v61  ;;  %3293 = vmatprep.mubr.f32.mxu1 %v3961_v9  ;;  %v2102_v9 = vpop.permute.xlu0 %2101 }
 0x41e   :  { %3294 = vmatmul.mubr.f32.vlgmr.msra.gmra.mrb[4].mxu1 %v3981_v33 }
 0x41f   :  { %3296 = vmatprep.mubr.f32.mxu1 %v3983_v34 }
 0x422   :  { %3297 = vmatmul.mubr.f32.gmra.mrb[16].mxu1 %v3989_v37 }
 0x4cd   :  { %v3228_v10 = vpop.f32.mrb[6].mxu1 }
 0x4ce   :  { %v2222_v11 = vpop.f32.mrb[7].mxu1 }
 0x4d5   :  { %v3242_v20 = vpop.f32.mrb[8].mxu1 }
 0x4d6   :  { %v2332_v21 = vpop.f32.mrb[9].mxu1 }
 0x4dd   :  { %v3256_v22 = vpop.f32.mrb[10].mxu1 }
 0x4de   :  { %v2429_v23 = vpop.f32.mrb[11].mxu1 }
 0x4e5   :  { %v3270_v24 = vpop.f32.mrb[12].mxu1 }
 0x4e6   :  { %v2526_v25 = vpop.f32.mrb[13].mxu1 }
 0x4ed   :  { %v3284_v26 = vpop.f32.mrb[14].mxu1 }
 0x4ee   :  { %v2626_v27 = vpop.f32.mrb[15].mxu1 }
 0x4f1   :  { %v3295_v28 = vpop.f32.mrb[4].mxu1 }
 0x4f2   :  { %v2705_v29 = vpop.f32.mrb[5].mxu1 }
 0x4f3   :  { %v3503_v30 = vadd.f32 %v2705_v29, %v2102_v9 }
 0x4f5   :  { %2724 = vst [vmem:[#allocation2] sm:$0x1] %v3503_v30  ;;  %v3298_v31 = vpop.f32.mrb[16].mxu1 }
 0x4f6   :  { %v2716_v32 = vpop.f32.mrb[17].mxu1 }
 0x4f7   :  { %3628 = shalt.err (!%p3625_p4)
}
 0x4f8   :  { %s3629_s8 = scalar_lea.hbm %s4052_s3, 16 }
 0x4f9   :  { %p3630_p5 = scmp.ne.s32.totalorder %s4052_s3, %s3629_s8  ;;  %p3633_p6 = scmp.lt.u32.totalorder %s3629_s8, %s4052_s3 }
 0x4fb   :  { %p3635_p7 = pnand %p3633_p6, %p3630_p5 }
 0x4fd   :  { %3638 = shalt.err (!%p3635_p7)
}
 0x4fe   :  { %2734 = dma.vmem_to_hbm [thread:$0]  %s2732_s2, 16, %s4052_s3, [#allocation3]  }
 0x4ff   :  { %3639 = dma.done.wait [#allocation3], 16  }
 0x500   :  { %3640 = vsyncadd [#allocation3], 4294967280 }
 0x501   :  { %2738 = vsyncpa [#allocation3], 1 }

</bundles_post_ra>
